<compile_context>
chip_gen: v7x
topology: tpu7x:2x2x1
jax: 0.10.0
libtpu: 0.0.40
codegen_flags: <defaults>
</compile_context>

<pallas_src>
import jax
import jax.numpy as jnp
from jax.experimental import pallas as pl
from jax.experimental.pallas import tpu as pltpu

_LANE = 128


def _default_act(v):
    # ReLU stands in for the user-supplied `act`; runs on the VPU.
    return jnp.maximum(v, 0)


def _make_act_kernel(act):
    def kernel(x_ref, o_ref):
        # Elementwise activation; inference dropout is the identity.
        o_ref[...] = act(x_ref[...]).astype(o_ref.dtype)
    return kernel


def _chip_defaults():
    """Per-generation (block_bytes, vmem_limit_bytes, split_for_two_cores)."""
    kind = ""
    try:
        kind = jax.devices()[0].device_kind.lower()
    except Exception:
        pass
    if "v7" in kind:
        # 3.2 TB/s HBM: 8 MiB tiles amortize the ~0.35 us per-step overhead;
        # 4 x 8 MiB double-buffered footprint needs an explicit scoped-VMEM
        # budget (default 32 MiB of the 64 MiB physical).
        return 8 << 20, 48 << 20, True
    if "v6" in kind:
        # 4 x 6 MiB = 24 MiB stays under the 32 MiB default scoped limit.
        return 6 << 20, None, False
    if "v5" in kind:
        # 4 x 2 MiB = 8 MiB stays under the 16 MiB default scoped limit.
        return 2 << 20, None, False
    return 4 << 20, None, False


def _tiled_elementwise_2d(x, act, *, block_bytes, vmem_limit, split_two, donate):
    """Elementwise `act` over a 2D array, tiled (batch[, dim]) and pipelined."""
    b, d = x.shape
    itemsize = jnp.dtype(x.dtype).itemsize
    sublane = max(8, 32 // itemsize)   # 8 for f32, 16 for bf16, 32 for int8

    kernel = _make_act_kernel(act)

    if d * itemsize * sublane <= block_bytes:
        # Tile only the batch axis; keep the block's last dim == full d
        # (legal per the (8,128) rule even when d % 128 != 0).
        tile_d = d
        grid_d = 1
        rows = max(sublane,
                   (block_bytes // max(1, d * itemsize)) // sublane * sublane)
        tile_b = b if b <= rows else rows          # full-dim OR multiple of 8
    else:
        # Very wide rows: add a dim-axis grid so one block can never blow
        # VMEM on any generation.  tile_d is a multiple of 128 -> stores stay
        # lane-dense; the edge dim block (if any) is masked by Pallas.
        tile_d = max(_LANE,
                     (block_bytes // (sublane * itemsize)) // _LANE * _LANE)
        grid_d = pl.cdiv(d, tile_d)
        tile_b = b if b < sublane else sublane

    grid_b = pl.cdiv(b, tile_b)

    # v7x: make sure the 'parallel' grid has >= 2 steps so both TensorCores
    # stream (single-TC chips are unaffected; one extra step is ~0.35 us).
    if split_two and grid_b * grid_d == 1 and b >= 2 * sublane:
        tile_b = pl.cdiv(pl.cdiv(b, 2), sublane) * sublane
        grid_b = pl.cdiv(b, tile_b)

    params = dict(dimension_semantics=("parallel", "parallel"))
    if vmem_limit is not None:
        params["vmem_limit_bytes"] = vmem_limit

    # Only alias when the caller actually donates x; otherwise XLA would
    # insert a defensive full-array copy (extra HBM pass).
    alias = {0: 0} if donate else {}

    return pl.pallas_call(
        kernel,
        out_shape=jax.ShapeDtypeStruct((b, d), x.dtype),
        grid=(grid_b, grid_d),
        in_specs=[pl.BlockSpec((tile_b, tile_d), lambda i, j: (i, j))],
        out_specs=pl.BlockSpec((tile_b, tile_d), lambda i, j: (i, j)),
        input_output_aliases=alias,
        compiler_params=pltpu.CompilerParams(**params),
    )(x)


def apply_act(x, *, act=_default_act, donate=False, target_block_bytes=None):
    """Elementwise act (default ReLU) + inference dropout (identity) on (b, d)."""
    b, d = x.shape
    block_bytes, vmem_limit, split_two = _chip_defaults()
    if target_block_bytes is not None:
        block_bytes = target_block_bytes

    # Lane-unaligned dim: flatten to lane-dense rows (pure layout reshape of a
    # contiguous array -- no extra HBM traffic) so stores are unmasked `vst`.
    if d % _LANE != 0:
        for w in (4096, 2048, 1024, 512, 256, _LANE):
            if (b * d) % w == 0:
                xf = x.reshape(b * d // w, w)
                yf = _tiled_elementwise_2d(
                    xf, act, block_bytes=block_bytes, vmem_limit=vmem_limit,
                    split_two=split_two, donate=donate)
                return yf.reshape(b, d)
        # No lane-dense factorization exists: fall through to the full-width
        # path (edge lanes use masked stores but remain correct).

    return _tiled_elementwise_2d(
        x, act, block_bytes=block_bytes, vmem_limit=vmem_limit,
        split_two=split_two, donate=donate)


class Aggregator:
    """JAX mirror of the PyTorch base Aggregator."""

    def __init__(self, batch_size, dim, dropout, act, name=None):
        self.dropout = dropout
        self.act = act
        self.batch_size = batch_size
        self.dim = dim
        self.name = name

    def forward(self):
        # TODO(synk): reference forward() body is `pass` (returns None); there
        # is no computation to translate -- subclasses would use apply_act().
        # TODO(synk): training-mode dropout (pltpu.prng_*) intentionally
        # omitted; inference dropout is the identity.
        return None

    __call__ = forward


if __name__ == "__main__":
    key = jax.random.PRNGKey(0)

    batch_size, dim = 8, 128
    agg = Aggregator(batch_size=batch_size, dim=dim, dropout=0.1,
                     act=_default_act, name="base")

    # Exact reference semantics: forward() returns None.
    assert agg.forward() is None

    k1, k2, k3, k4, k5 = jax.random.split(key, 5)

    # 1) Aligned (module-sized) case: single block, no masking.
    x = jax.random.normal(k1, (batch_size, dim), dtype=jnp.float32)
    y = apply_act(x)
    jax.block_until_ready(y)
    assert y.shape == x.shape and y.dtype == x.dtype
    assert jnp.allclose(y, jnp.maximum(x, 0.0)), "mismatch (aligned)"

    # 2) Lane-unaligned, non-factorizable case: full-dim block fallback.
    x2 = jax.random.normal(k2, (6, 200), dtype=jnp.float32)
    y2 = apply_act(x2)
    jax.block_until_ready(y2)
    assert jnp.allclose(y2, jnp.maximum(x2, 0.0)), "mismatch (unaligned)"

    # 3) Lane-unaligned but factorizable: exercises the flatten path.
    x3 = jax.random.normal(k3, (16, 96), dtype=jnp.float32)
    y3 = apply_act(x3)
    jax.block_until_ready(y3)
    assert jnp.allclose(y3, jnp.maximum(x3, 0.0)), "mismatch (flattened)"

    # 4) Batch-tiled multi-step grid (small block budget to force tiling).
    x4 = jax.random.normal(k4, (512, 256), dtype=jnp.float32)
    y4 = apply_act(x4, target_block_bytes=64 * 1024)
    jax.block_until_ready(y4)
    assert jnp.allclose(y4, jnp.maximum(x4, 0.0)), "mismatch (batch-tiled)"

    # 5) Dim-tiled grid (wide rows relative to the block budget).
    x5 = jax.random.normal(k5, (16, 1024), dtype=jnp.float32)
    y5 = apply_act(x5, target_block_bytes=16 * 1024)
    jax.block_until_ready(y5)
    assert jnp.allclose(y5, jnp.maximum(x5, 0.0)), "mismatch (dim-tiled)"

    print("KERNEL_OK")
</pallas_src>

<mosaic_0001>
module attributes {stable_mosaic.version = 11 : i64} {
  func.func @kernel(%arg0: i32, %arg1: i32, %arg2: memref<8x128xf32, #tpu.memory_space<vmem>>, %arg3: memref<8x128xf32, #tpu.memory_space<vmem>>) attributes {dimension_semantics = [#tpu.dimension_semantics<parallel>, #tpu.dimension_semantics<parallel>], iteration_bounds = array<i64: 1, 1>, scalar_prefetch = 0 : i64, scratch_operands = 0 : i64, tpu.core_type = #tpu.core_type<tc>, window_params = [{transform_indices = @transform_0, window_bounds = array<i64: 8, 128>}, {transform_indices = @transform_1, window_bounds = array<i64: 8, 128>}]} {
    %c0 = arith.constant 0 : index
    %c0_0 = arith.constant 0 : index
    %0 = vector.load %arg2[%c0, %c0_0] : memref<8x128xf32, #tpu.memory_space<vmem>>, vector<8x128xf32>
    %cst = arith.constant 0.000000e+00 : f32
    %1 = vector.broadcast %cst : f32 to vector<8x128xf32>
    %2 = arith.maximumf %0, %1 : vector<8x128xf32>
    %c0_1 = arith.constant 0 : index
    %c0_2 = arith.constant 0 : index
    %3 = vector.load %arg3[%c0_1, %c0_2] : memref<8x128xf32, #tpu.memory_space<vmem>>, vector<8x128xf32>
    tpu.vector_store %arg3[%c0_1, %c0_2], %2 {strides = array<i32>} : memref<8x128xf32, #tpu.memory_space<vmem>>, vector<8x128xf32>,
    return
  }
  func.func @transform_0(%arg0: i32, %arg1: i32) -> (i32, i32) {
    %c0_i32 = arith.constant 0 : i32
    return %arg0, %arg1 : i32, i32
  }
  func.func @transform_1(%arg0: i32, %arg1: i32) -> (i32, i32) {
    %c0_i32 = arith.constant 0 : i32
    return %arg0, %arg1 : i32, i32
  }
}

</mosaic_0001>

<bundles_post_ra>
// kernel: tpu_custom_call.1
= control target key start
LH: loop header
LB: loop body
LE: loop exit
PB: predicated region body
PF: predicated region fallthrough
CT: control target
= control target key end

     0   :  { %6 = vsyncpa [#allocation3], 0  ;;  %s125_s0 = inlined_call_operand.hbm [shape: f32[8,128], index: 0, kind: input, shape index: {}]   ;;  %s126_s1 = inlined_call_operand.hbm [shape: f32[8,128], index: 1, kind: output, shape index: {}]  }
   0x1   :  { %7 = vsyncpa [#allocation4], 0  ;;  %s89_s6 = smov [#allocation2]   ;;  %s41_s10 = scalar_lea.hbm %s125_s0, 128 }
   0x2   :  { %s14_s7 = sshll.u32 %s89_s6, 4  ;;  %p42_p0 = scmp.ne.s32.totalorder %s125_s0, %s41_s10  ;;  %s15_s7 = int_to_ptr.vmem [resolvable:$true] %s14_s7 }
   0x3   :  { %p45_p1 = scmp.lt.u32.totalorder %s41_s10, %s125_s0 }
   0x5   :  { %p47_p2 = pnand %p45_p1, %p42_p0 }
   0x7   :  { %50 = shalt.err (!%p47_p2)
}
   0x8   :  { %s51_s15 = scalar_lea.vmem %s15_s7, 128  ;;  %p56_p4 = scmp.lt.s32.totalorder %s15_s7, %s15_s7 }
   0x9   :  { %p52_p3 = scmp.ne.s32.totalorder %s15_s7, %s51_s15  ;;  %p57_p5 = scmp.lt.s32.totalorder %s51_s15, %s51_s15 }
   0xb   :  { %p58_p6 = por %p57_p5, %p56_p4 }
   0xd   :  { %p59_p7 = pnand %p58_p6, %p52_p3 }
   0xf   :  { %62 = shalt.err (!%p59_p7)
}
  0x10   :  { %17 = dma.hbm_to_vmem [thread:$0]  %s125_s0, 128, %s15_s7, [#allocation3]  }
  0x11   :  { %85 = dma.done.wait [#allocation3], 128  }
  0x12   :  { %86 = vsyncadd [#allocation3], 4294967168  ;;  %s90_s18 = smov [#allocation5]   ;;  %v21_v0 = vld [vmem:[#allocation2] sm:$0xff] }
  0x13   :  { %s30_s19 = sshll.u32 %s90_s18, 4  ;;  %v22_v1 = vmax.f32 %v21_v0, 0.0  ;;  %s31_s19 = int_to_ptr.vmem [resolvable:$true] %s30_s19 }
  0x14   :  { %s63_s20 = scalar_lea.vmem %s31_s19, 128  ;;  %p68_p9 = scmp.lt.s32.totalorder %s31_s19, %s31_s19 }
  0x15   :  { %23 = vst [vmem:[#allocation5] sm:$0xff] %v22_v1  ;;  %p64_p8 = scmp.ne.s32.totalorder %s31_s19, %s63_s20  ;;  %p69_p10 = scmp.lt.s32.totalorder %s63_s20, %s63_s20 }
  0x17   :  { %p70_p11 = por %p69_p10, %p68_p9 }
  0x19   :  { %p71_p12 = pnand %p70_p11, %p64_p8 }
  0x1b   :  { %74 = shalt.err (!%p71_p12)
}
  0x1c   :  { %s75_s23 = scalar_lea.hbm %s126_s1, 128 }
  0x1d   :  { %p76_p13 = scmp.ne.s32.totalorder %s126_s1, %s75_s23  ;;  %p79_p0 = scmp.lt.u32.totalorder %s75_s23, %s126_s1 }
  0x1f   :  { %p81_p1 = pnand %p79_p0, %p76_p13 }
  0x21   :  { %84 = shalt.err (!%p81_p1)
}
  0x22   :  { %33 = dma.vmem_to_hbm [thread:$0]  %s31_s19, 128, %s126_s1, [#allocation4]  }
  0x23   :  { %87 = dma.done.wait [#allocation4], 128  }
  0x24   :  { %88 = vsyncadd [#allocation4], 4294967168 }
  0x25   :  { %37 = vsyncpa [#allocation3], 1 }
  0x26   :  { %38 = vsyncpa [#allocation4], 1 }

</bundles_post_ra>
